<compile_context>
chip_gen: v5e
topology: v5e:2x2
jax: 0.10.0
libtpu: 0.0.40
codegen_flags: <defaults>
</compile_context>

<pallas_src>
import functools

import jax
import jax.numpy as jnp
from jax.experimental import pallas as pl
from jax.experimental.pallas import tpu as pltpu


def _round_up(x, m):
    return ((x + m - 1) // m) * m


def pi_kernel(x_ref, p_ref, o_ref, *, dim_s, width):
    """Fused 3-layer MLP on one batch tile.

    x_ref: [TILE_B, dim_s]
    p_ref: packed parameter slab [rows, width] (VMEM-resident across grid)
    o_ref: [TILE_B, width]  (lane-dense; real logits live in [:, :dim_a])
    """
    # Static row offsets inside the packed slab (all 8-row aligned).
    off_b1 = _round_up(dim_s, 8)
    off_w2 = off_b1 + 8
    off_b2 = off_w2 + width
    off_w3 = off_b2 + 8
    off_b3 = off_w3 + width

    x = x_ref[...]

    w1 = p_ref[0:dim_s, :]                       # [dim_s, width] (cols 64+ zero)
    b1 = p_ref[off_b1:off_b1 + 1, :]             # [1, width]
    w2 = p_ref[off_w2:off_w2 + width, :]         # [width, width] (rows 64+ / cols 32+ zero)
    b2 = p_ref[off_b2:off_b2 + 1, :]
    w3 = p_ref[off_w3:off_w3 + width, :]         # [width, width] (rows 32+ / cols dim_a+ zero)
    b3 = p_ref[off_b3:off_b3 + 1, :]

    # Layer 1: [TILE_B, dim_s] @ [dim_s, width] -> tanh   (MXU + EUP)
    h1 = jnp.tanh(
        jnp.dot(x, w1, preferred_element_type=jnp.float32) + b1
    ).astype(w2.dtype)
    # Layer 2
    h2 = jnp.tanh(
        jnp.dot(h1, w2, preferred_element_type=jnp.float32) + b2
    ).astype(w3.dtype)
    # Layer 3 (logits head), lane-dense store
    out = jnp.dot(h2, w3, preferred_element_type=jnp.float32) + b3
    o_ref[...] = out.astype(o_ref.dtype)


def pack_params(params, dim_s, dim_a, dtype=jnp.float32):
    """Pack (w1,b1,w2,b2,w3,b3) into one zero-padded, lane-dense slab.

    Weights are stored [in_features, out_features] (transposed vs PyTorch).
    Zero padding is semantics-preserving: padded bias entries are 0, so
    tanh(0) = 0 in the padded hidden lanes, and padded weight rows are 0,
    so those lanes contribute nothing downstream.
    """
    w1, b1, w2, b2, w3, b3 = params
    width = max(128, _round_up(dim_a, 128))

    off_b1 = _round_up(dim_s, 8)
    off_w2 = off_b1 + 8
    off_b2 = off_w2 + width
    off_w3 = off_b2 + 8
    off_b3 = off_w3 + width
    rows = off_b3 + 8

    slab = jnp.zeros((rows, width), jnp.float32)
    slab = slab.at[0:dim_s, 0:64].set(w1)
    slab = slab.at[off_b1, 0:64].set(b1.reshape(-1))
    slab = slab.at[off_w2:off_w2 + 64, 0:32].set(w2)
    slab = slab.at[off_b2, 0:32].set(b2.reshape(-1))
    slab = slab.at[off_w3:off_w3 + 32, 0:dim_a].set(w3)
    slab = slab.at[off_b3, 0:dim_a].set(b3.reshape(-1))
    return slab.astype(dtype)


def pi_forward(x, packed, dim_s, dim_a, *, tile_b=1024):
    """Run the fused Pi MLP. Returns [B, dim_a] float32 logits."""
    B = x.shape[0]
    rows, width = packed.shape

    # Batch tile: large enough for pipelining at real batch sizes, shrinks for
    # tiny demo batches. Always a multiple of 8 (sublane-aligned).
    TILE_B = max(8, min(tile_b, _round_up(B, 8)))
    B_pad = _round_up(B, TILE_B)

    x = x.astype(packed.dtype)
    if B_pad != B:
        x = jnp.pad(x, ((0, B_pad - B), (0, 0)))

    grid = (B_pad // TILE_B,)

    out = pl.pallas_call(
        functools.partial(pi_kernel, dim_s=dim_s, width=width),
        out_shape=jax.ShapeDtypeStruct((B_pad, width), jnp.float32),
        grid_spec=pltpu.PrefetchScalarGridSpec(
            num_scalar_prefetch=0,
            grid=grid,
            in_specs=[
                # x tile marches down the batch.
                pl.BlockSpec((TILE_B, x.shape[1]), lambda i: (i, 0)),
                # Packed parameter slab: same block every step -> VMEM-resident,
                # DMA'd from HBM only once.
                pl.BlockSpec((rows, width), lambda i: (0, 0)),
            ],
            out_specs=pl.BlockSpec((TILE_B, width), lambda i: (i, 0)),
        ),
        compiler_params=pltpu.CompilerParams(
            dimension_semantics=("parallel",),  # megacore sharding on v7x
        ),
    )(x, packed)

    return out[:B, :dim_a]


def init_params(key, dim_s, dim_a):
    """Deterministic init mimicking PyTorch's default Linear init
    (uniform in [-1/sqrt(fan_in), 1/sqrt(fan_in)]); weights as [in, out]."""
    def linear(k, fan_in, fan_out):
        kw, kb = jax.random.split(k)
        bound = 1.0 / jnp.sqrt(fan_in)
        w = jax.random.uniform(kw, (fan_in, fan_out), jnp.float32, -bound, bound)
        b = jax.random.uniform(kb, (1, fan_out), jnp.float32, -bound, bound)
        return w, b

    k1, k2, k3 = jax.random.split(key, 3)
    w1, b1 = linear(k1, dim_s, 64)
    w2, b2 = linear(k2, 64, 32)
    w3, b3 = linear(k3, 32, dim_a)
    return (w1, b1, w2, b2, w3, b3)


def pi_reference(x, params):
    """Pure-JAX reference of the same forward pass."""
    w1, b1, w2, b2, w3, b3 = params
    h1 = jnp.tanh(x @ w1 + b1)
    h2 = jnp.tanh(h1 @ w2 + b2)
    return h2 @ w3 + b3


if __name__ == "__main__":
    key = jax.random.PRNGKey(0)
    k_params, k_x = jax.random.split(key)

    batch, dim_s, dim_a = 8, 16, 4
    params = init_params(k_params, dim_s, dim_a)
    packed = pack_params(params, dim_s, dim_a)          # pack + pad once
    x = jax.random.normal(k_x, (batch, dim_s), jnp.float32)

    out = pi_forward(x, packed, dim_s, dim_a)
    out = jax.block_until_ready(out)

    ref = pi_reference(x, params)
    assert out.shape == (batch, dim_a)
    assert jnp.allclose(out, ref, atol=1e-5, rtol=1e-5)

    print("KERNEL_OK")
</pallas_src>

<mosaic_0001>
module attributes {stable_mosaic.version = 11 : i64} {
  func.func @pi_kernel(%arg0: i32, %arg1: memref<8x16xf32, #tpu.memory_space<vmem>>, %arg2: memref<296x128xf32, #tpu.memory_space<vmem>>, %arg3: memref<8x128xf32, #tpu.memory_space<vmem>>) attributes {dimension_semantics = [#tpu.dimension_semantics<parallel>], iteration_bounds = array<i64: 1>, scalar_prefetch = 0 : i64, scratch_operands = 0 : i64, tpu.core_type = #tpu.core_type<tc>, window_params = [{transform_indices = @transform_0, window_bounds = array<i64: 8, 16>}, {pipeline_mode = #tpu.pipeline_mode<synchronous>, transform_indices = @transform_1, window_bounds = array<i64: 296, 128>}, {transform_indices = @transform_2, window_bounds = array<i64: 8, 128>}]} {
    %c0 = arith.constant 0 : index
    %c0_0 = arith.constant 0 : index
    %0 = vector.load %arg1[%c0, %c0_0] : memref<8x16xf32, #tpu.memory_space<vmem>>, vector<8x16xf32>
    %c0_1 = arith.constant 0 : index
    %c0_2 = arith.constant 0 : index
    %1 = vector.load %arg2[%c0_1, %c0_2] : memref<296x128xf32, #tpu.memory_space<vmem>>, vector<16x128xf32>
    %c16 = arith.constant 16 : index
    %c0_3 = arith.constant 0 : index
    %2 = vector.load %arg2[%c16, %c0_3] : memref<296x128xf32, #tpu.memory_space<vmem>>, vector<1x128xf32>
    %c24 = arith.constant 24 : index
    %c0_4 = arith.constant 0 : index
    %3 = vector.load %arg2[%c24, %c0_4] : memref<296x128xf32, #tpu.memory_space<vmem>>, vector<128x128xf32>
    %c152 = arith.constant 152 : index
    %c0_5 = arith.constant 0 : index
    %4 = vector.load %arg2[%c152, %c0_5] : memref<296x128xf32, #tpu.memory_space<vmem>>, vector<1x128xf32>
    %c160 = arith.constant 160 : index
    %c0_6 = arith.constant 0 : index
    %5 = vector.load %arg2[%c160, %c0_6] : memref<296x128xf32, #tpu.memory_space<vmem>>, vector<128x128xf32>
    %c288 = arith.constant 288 : index
    %c0_7 = arith.constant 0 : index
    %6 = vector.load %arg2[%c288, %c0_7] : memref<296x128xf32, #tpu.memory_space<vmem>>, vector<1x128xf32>
    %cst = arith.constant dense<0.000000e+00> : vector<8x128xf32>
    %7 = tpu.matmul %0, %1, %cst {dimension_numbers = #tpu.dot_dimension_numbers<[1], [0], [0], [1], [0, 0, 1, 1], [], []>} : vector<8x16xf32>, vector<16x128xf32>, vector<8x128xf32> -> vector<8x128xf32>
    %8 = vector.broadcast %2 : vector<1x128xf32> to vector<8x128xf32>
    %9 = arith.addf %7, %8 : vector<8x128xf32>
    %10 = math.tanh %9 : vector<8x128xf32>
    %cst_8 = arith.constant dense<0.000000e+00> : vector<8x128xf32>
    %11 = tpu.matmul %10, %3, %cst_8 {dimension_numbers = #tpu.dot_dimension_numbers<[1], [0], [0], [1], [0, 0, 1, 1], [], []>} : vector<8x128xf32>, vector<128x128xf32>, vector<8x128xf32> -> vector<8x128xf32>
    %12 = vector.broadcast %4 : vector<1x128xf32> to vector<8x128xf32>
    %13 = arith.addf %11, %12 : vector<8x128xf32>
    %14 = math.tanh %13 : vector<8x128xf32>
    %cst_9 = arith.constant dense<0.000000e+00> : vector<8x128xf32>
    %15 = tpu.matmul %14, %5, %cst_9 {dimension_numbers = #tpu.dot_dimension_numbers<[1], [0], [0], [1], [0, 0, 1, 1], [], []>} : vector<8x128xf32>, vector<128x128xf32>, vector<8x128xf32> -> vector<8x128xf32>
    %16 = vector.broadcast %6 : vector<1x128xf32> to vector<8x128xf32>
    %17 = arith.addf %15, %16 : vector<8x128xf32>
    %c0_10 = arith.constant 0 : index
    %c0_11 = arith.constant 0 : index
    %18 = vector.load %arg3[%c0_10, %c0_11] : memref<8x128xf32, #tpu.memory_space<vmem>>, vector<8x128xf32>
    tpu.vector_store %arg3[%c0_10, %c0_11], %17 {strides = array<i32>} : memref<8x128xf32, #tpu.memory_space<vmem>>, vector<8x128xf32>,
    return
  }
  func.func @transform_0(%arg0: i32) -> (i32, i32) {
    %c0_i32 = arith.constant 0 : i32
    %c0_i32_0 = arith.constant 0 : i32
    return %arg0, %c0_i32 : i32, i32
  }
  func.func @transform_1(%arg0: i32) -> (i32, i32) {
    %c0_i32 = arith.constant 0 : i32
    %c0_i32_0 = arith.constant 0 : i32
    %c0_i32_1 = arith.constant 0 : i32
    return %c0_i32, %c0_i32_0 : i32, i32
  }
  func.func @transform_2(%arg0: i32) -> (i32, i32) {
    %c0_i32 = arith.constant 0 : i32
    %c0_i32_0 = arith.constant 0 : i32
    return %arg0, %c0_i32 : i32, i32
  }
}

</mosaic_0001>

<bundles_post_ra>
// kernel: tpu_custom_call.1
= control target key start
LH: loop header
LB: loop body
LE: loop exit
PB: predicated region body
PF: predicated region fallthrough
CT: control target
= control target key end

     0   :  { %7 = vsyncpa [#allocation3], 0  ;;  %s288_s0 = inlined_call_operand.hbm [shape: f32[8,16], index: 0, kind: input, shape index: {}]   ;;  %s289_s1 = inlined_call_operand.hbm [shape: f32[296,128], index: 1, kind: input, shape index: {}]   ;;  %s290_s2 = inlined_call_operand.hbm [shape: f32[8,128], index: 2, kind: output, shape index: {}]  }
   0x1   :  { %8 = vsyncpa [#allocation6], 0 }
   0x2   :  { %9 = vsyncpa [#allocation4], 0  ;;  %s15_s11 = sshll.u32 %s288_s0, 4  ;;  %s259_s12 = smov [#allocation2]   ;;  %s16_s11 = int_to_ptr.hbm [resolvable:$true] %s15_s11 }
   0x3   :  { %s17_s13 = sshll.u32 %s259_s12, 4  ;;  %s25_s16 = sshll.u32 %s289_s1, 4  ;;  %s18_s13 = int_to_ptr.vmem [resolvable:$true] %s17_s13  ;;  %s26_s16 = int_to_ptr.hbm [resolvable:$true] %s25_s16 }
   0x4   :  { %20 = dma.hbm_to_vmem [thread:$0]  %s16_s11, 128, %s18_s13, [#allocation3]  }
   0x5   :  { %s260_s17 = smov [#allocation5]   ;;  %s261_s19 = smov 128  }
   0x6   :  { %s27_s18 = sshll.u32 %s260_s17, 4  ;;  %s262_s20 = smov 8   ;;  %s28_s18 = int_to_ptr.vmem [resolvable:$true] %s27_s18 }
   0x7   :  { %33 = dma.hbm_to_vmem [thread:$0]  %s26_s16, 4736, %s28_s18, [#allocation6], %s261_s19, %s261_s19, %s262_s20  }
   0x8   :  { %253 = dma.done.wait [#allocation3], 128  }
   0x9   :  { %254 = vsyncadd [#allocation3], 4294967168 }
   0xa   :  { %255 = dma.done.wait [#allocation6], 4736  }
   0xb   :  { %256 = vsyncadd [#allocation6], 4294962560  ;;  %v44_v0 = vld [vmem:[#allocation5 + $0x8] sm:$0xff]  ;;  %v43_v1 = vld [vmem:[#allocation5] sm:$0xff]  ;;  %vm81_vm0 = vcmask 130048   ;;  %s263_s0 = smov [#allocation7]  }
   0xc   :  { %99 = vmatpush.msra.mxu0 %v44_v0  ;;  %v42_v2 = vld [vmem:[#allocation2] sm:$0xff]  ;;  %v61_v3 = vld [vmem:[#allocation5 + $0x90] sm:$0xff]  ;;  %v60_v4 = vld [vmem:[#allocation5 + $0x88] sm:$0xff]  ;;  %s155_s1 = sshll.u32 %s263_s0, 4  ;;  %s157_s23 = sshll.u32 %s290_s2, 4  ;;  %s156_s1 = int_to_ptr.vmem [resolvable:$true] %s155_s1  ;;  %s158_s23 = int_to_ptr.hbm [resolvable:$true] %s157_s23 }
   0xd   :  { %107 = vmatpush.msra.mxu1 %v61_v3  ;;  %v59_v5 = vld [vmem:[#allocation5 + $0x80] sm:$0xff]  ;;  %v58_v6 = vld [vmem:[#allocation5 + $0x78] sm:$0xff]  ;;  %v57_v7 = vld [vmem:[#allocation5 + $0x70] sm:$0xff] }
   0xe   :  { %100 = vmatpush.msra.mxu0 %v43_v1  ;;  %v56_v8 = vld [vmem:[#allocation5 + $0x68] sm:$0xff]  ;;  %v55_v9 = vld [vmem:[#allocation5 + $0x60] sm:$0xff]  ;;  %v54_v10 = vld [vmem:[#allocation5 + $0x58] sm:$0xff] }
   0xf   :  { %168 = vmatmul.msk.f32.vlgmr.msra.gmra.mxu0 %vm81_vm0, %v42_v2  ;;  %108 = vmatpush.msra.mxu1 %v60_v4  ;;  %v53_v11 = vld [vmem:[#allocation5 + $0x50] sm:$0xff]  ;;  %v52_v12 = vld [vmem:[#allocation5 + $0x48] sm:$0xff]  ;;  %v51_v13 = vld [vmem:[#allocation5 + $0x40] sm:$0xff] }
  0x10   :  { %v50_v14 = vld [vmem:[#allocation5 + $0x38] sm:$0xff]  ;;  %v49_v15 = vld [vmem:[#allocation5 + $0x30] sm:$0xff]  ;;  %v48_v16 = vld [vmem:[#allocation5 + $0x28] sm:$0xff] }
  0x11   :  { %109 = vmatpush.msra.mxu1 %v59_v5  ;;  %v47_v17 = vld [vmem:[#allocation5 + $0x20] sm:$0xff]  ;;  %v46_v18 = vld [vmem:[#allocation5 + $0x18] sm:$0xff]  ;;  %v77_v20 = vld [vmem:[#allocation5 + $0x110] sm:$0xff] }
  0x12   :  { %v78_v19 = vld [vmem:[#allocation5 + $0x118] sm:$0xff]  ;;  %v76_v21 = vld [vmem:[#allocation5 + $0x108] sm:$0xff]  ;;  %v75_v22 = vld [vmem:[#allocation5 + $0x100] sm:$0xff] }
  0x13   :  { %110 = vmatpush.msra.mxu1 %v58_v6  ;;  %129 = vmatpush.msra.mxu2 %v78_v19  ;;  %v74_v23 = vld [vmem:[#allocation5 + $0xf8] sm:$0xff]  ;;  %v73_v24 = vld [vmem:[#allocation5 + $0xf0] sm:$0xff]  ;;  %v72_v25 = vld [vmem:[#allocation5 + $0xe8] sm:$0xff] }
  0x14   :  { %v71_v26 = vld [vmem:[#allocation5 + $0xe0] sm:$0xff]  ;;  %v70_v27 = vld [vmem:[#allocation5 + $0xd8] sm:$0xff]  ;;  %v69_v28 = vld [vmem:[#allocation5 + $0xd0] sm:$0xff] }
  0x15   :  { %111 = vmatpush.msra.mxu1 %v57_v7  ;;  %130 = vmatpush.msra.mxu2 %v77_v20  ;;  %v68_v29 = vld [vmem:[#allocation5 + $0xc8] sm:$0xff]  ;;  %v174_v30 = vld [vmem:[#allocation5 + $0x10] ss:$0 sm:$0xff]  ;;  %v67_v34 = vld [vmem:[#allocation5 + $0xc0] sm:$0xff] }
  0x16   :  { %v66_v35 = vld [vmem:[#allocation5 + $0xb8] sm:$0xff]  ;;  %v65_v36 = vld [vmem:[#allocation5 + $0xb0] sm:$0xff]  ;;  %v64_v37 = vld [vmem:[#allocation5 + $0xa8] sm:$0xff] }
  0x17   :  { %112 = vmatpush.msra.mxu1 %v56_v8  ;;  %131 = vmatpush.msra.mxu2 %v76_v21  ;;  %v63_v38 = vld [vmem:[#allocation5 + $0xa0] sm:$0xff]  ;;  %v175_v39 = vld [vmem:[#allocation5 + $0x98] ss:$0 sm:$0xff] }
  0x18   :  { %v176_v43 = vld [vmem:[#allocation5 + $0x120] ss:$0 sm:$0xff] }
  0x19   :  { %113 = vmatpush.msra.mxu1 %v55_v9  ;;  %132 = vmatpush.msra.mxu2 %v75_v22 }
  0x1b   :  { %114 = vmatpush.msra.mxu1 %v54_v10  ;;  %133 = vmatpush.msra.mxu2 %v74_v23 }
  0x1d   :  { %115 = vmatpush.msra.mxu1 %v53_v11  ;;  %134 = vmatpush.msra.mxu2 %v73_v24 }
  0x1f   :  { %116 = vmatpush.msra.mxu1 %v52_v12  ;;  %135 = vmatpush.msra.mxu2 %v72_v25 }
  0x21   :  { %117 = vmatpush.msra.mxu1 %v51_v13  ;;  %136 = vmatpush.msra.mxu2 %v71_v26 }
  0x23   :  { %118 = vmatpush.msra.mxu1 %v50_v14  ;;  %137 = vmatpush.msra.mxu2 %v70_v27 }
  0x25   :  { %119 = vmatpush.msra.mxu1 %v49_v15  ;;  %138 = vmatpush.msra.mxu2 %v69_v28 }
  0x27   :  { %120 = vmatpush.msra.mxu1 %v48_v16  ;;  %139 = vmatpush.msra.mxu2 %v68_v29 }
  0x29   :  { %121 = vmatpush.msra.mxu1 %v47_v17  ;;  %140 = vmatpush.msra.mxu2 %v67_v34 }
  0x2b   :  { %122 = vmatpush.msra.mxu1 %v46_v18  ;;  %141 = vmatpush.msra.mxu2 %v66_v35 }
  0x2d   :  { %142 = vmatpush.msra.mxu2 %v65_v36 }
  0x2f   :  { %143 = vmatpush.msra.mxu2 %v64_v37 }
  0x31   :  { %144 = vmatpush.msra.mxu2 %v63_v38 }
  0x8c   :  { %v102_v31 = vpop.f32.mrf.mxu0 }
  0x8d   :  { %v103_v32 = vadd.f32 %v174_v30, %v102_v31 }
  0x8f   :  { %177 = vtanh.f32 %v103_v32 }
  0x95   :  { %v178_v33 = vpop.eup %177 }
  0x96   :  { %123 = vmatmul.f32.vlgmr.msra.gmra.mxu1 %v178_v33 }
 0x113   :  { %v124_v40 = vpop.f32.mrf.mxu1 }
 0x114   :  { %v125_v41 = vadd.f32 %v175_v39, %v124_v40 }
 0x116   :  { %179 = vtanh.f32 %v125_v41 }
 0x11c   :  { %v180_v42 = vpop.eup %179 }
 0x11d   :  { %145 = vmatmul.f32.vlgmr.msra.gmra.mxu2 %v180_v42 }
 0x1a0   :  { %v146_v44 = vpop.f32.mrf.mxu2 }
 0x1a1   :  { %v147_v45 = vadd.f32 %v176_v43, %v146_v44 }
 0x1a3   :  { %149 = vst [vmem:[#allocation7] sm:$0xff] %v147_v45 }
 0x1a4   :  { %160 = dma.vmem_to_hbm [thread:$0]  %s156_s1, 128, %s158_s23, [#allocation4]  }
 0x1a5   :  { %257 = dma.done.wait [#allocation4], 128  }
 0x1a6   :  { %258 = vsyncadd [#allocation4], 4294967168 }
 0x1a7   :  { %165 = vsyncpa [#allocation3], 1 }
 0x1a8   :  { %166 = vsyncpa [#allocation6], 1 }
 0x1a9   :  { %167 = vsyncpa [#allocation4], 1 }

</bundles_post_ra>
